<compile_context>
chip_gen: v7x
topology: tpu7x:2x2x1
jax: 0.10.0
libtpu: 0.0.40
codegen_flags: <defaults>
</compile_context>

<pallas_src>
from itertools import combinations

import jax
import jax.numpy as jnp
from jax.experimental import pallas as pl
from jax.experimental.pallas import tpu as pltpu

NUM_CIFAR_CLASSES = 10
CIFAR_REAL_BIN_TASKS = [cls1 for cls1 in list(combinations(range(10), 5))[:126]]

LANES = 1024                      # lane-dense last dim (multiple of 128)
BLOCK_BYTES_BUDGET = 2 * 1024 * 1024   # per-buffer VMEM budget (safe on v5e/v6e/v7x)


def _bitmask_lookup_kernel(mask_ref, y_ref, out_ref):
    """out[i, j] = (mask >> y[i, j]) & 1  (table packed into one int32 bitmask)."""
    y = jnp.clip(y_ref[...], 0, NUM_CIFAR_CLASSES - 1)   # match jnp.take clamping
    out_ref[...] = jnp.right_shift(mask_ref[0], y) & jnp.int32(1)


def cifar_task_forward(table, y):
    """table: (10,) 0/1 int array (the nn.Parameter); y: integer labels, any shape."""
    orig_shape = y.shape
    n = int(y.size)
    y_flat = y.reshape(-1).astype(jnp.int32)

    # Pack the 10-entry 0/1 table into a single int32 bitmask (SMEM scalar).
    shifts = jnp.arange(NUM_CIFAR_CLASSES, dtype=jnp.int32)
    mask = (table.astype(jnp.int32) << shifts).sum().astype(jnp.int32).reshape(1)

    # Lane-dense 2-D layout: (rows, lanes), lanes a large multiple of 128.
    lanes = LANES if n >= LANES else 128
    rows = pl.cdiv(n, lanes)
    padded = rows * lanes
    if padded != n:
        y_flat = jnp.pad(y_flat, (0, padded - n))
    y2d = y_flat.reshape(rows, lanes)

    # One big block if it fits the VMEM budget; otherwise tile by large row blocks.
    max_block_rows = max(8, BLOCK_BYTES_BUDGET // (lanes * 4))
    if rows <= max_block_rows:
        block_rows = rows                      # single block == full array dims
    else:
        block_rows = max(8, (min(512, max_block_rows) // 8) * 8)
        pad_rows = (-rows) % block_rows
        if pad_rows:
            y2d = jnp.pad(y2d, ((0, pad_rows), (0, 0)))
            rows += pad_rows
    grid = (rows // block_rows,)

    out2d = pl.pallas_call(
        _bitmask_lookup_kernel,
        out_shape=jax.ShapeDtypeStruct((rows, lanes), jnp.int32),
        grid=grid,
        in_specs=[
            pl.BlockSpec(memory_space=pltpu.SMEM),                      # packed mask (1,)
            pl.BlockSpec((block_rows, lanes), lambda i: (i, 0)),        # labels block
        ],
        out_specs=pl.BlockSpec((block_rows, lanes), lambda i: (i, 0)),
        compiler_params=pltpu.CompilerParams(
            dimension_semantics=("parallel",)
        ),
    )(mask, y2d)

    return out2d.reshape(-1)[:n].reshape(orig_shape)


def make_lookup_table(task_idx: int = 0) -> jnp.ndarray:
    """Deterministic parameter init, mirroring CIFARClassificationTask.__init__."""
    positives = set(CIFAR_REAL_BIN_TASKS[task_idx])
    label2val = [int(i in positives) for i in range(NUM_CIFAR_CLASSES)]
    return jnp.asarray(label2val, dtype=jnp.int32)


if __name__ == "__main__":
    # Deterministic parameter (task_idx=0 -> classes {0,1,2,3,4} map to 1).
    table = make_lookup_table(task_idx=0)

    key = jax.random.PRNGKey(0)
    k1, k2 = jax.random.split(key)

    # Aligned batch: 2048 labels -> (2, 1024) lane-dense slab, single block.
    y = jax.random.randint(k1, (2048,), 0, NUM_CIFAR_CLASSES, dtype=jnp.int32)
    out = jax.block_until_ready(cifar_task_forward(table, y))
    ref = jnp.take(table, y)
    assert out.shape == y.shape and out.dtype == jnp.int32
    assert bool(jnp.all(out == ref)), "Pallas lookup does not match reference (aligned)"

    # Ragged batch: exercises the padding / un-padding path.
    y_ragged = jax.random.randint(k2, (777,), 0, NUM_CIFAR_CLASSES, dtype=jnp.int32)
    out_ragged = jax.block_until_ready(cifar_task_forward(table, y_ragged))
    assert bool(jnp.all(out_ragged == jnp.take(table, y_ragged))), \
        "Pallas lookup does not match reference (ragged)"

    print("KERNEL_OK")
</pallas_src>

<mosaic_0001>
module attributes {stable_mosaic.version = 11 : i64} {
  func.func @_bitmask_lookup_kernel(%arg0: i32, %arg1: memref<1xi32, #tpu.memory_space<smem>>, %arg2: memref<2x1024xi32, #tpu.memory_space<vmem>>, %arg3: memref<2x1024xi32, #tpu.memory_space<vmem>>) attributes {dimension_semantics = [#tpu.dimension_semantics<parallel>], iteration_bounds = array<i64: 1>, scalar_prefetch = 0 : i64, scratch_operands = 0 : i64, tpu.core_type = #tpu.core_type<tc>, window_params = [{transform_indices = @transform_0, window_bounds = array<i64: 1>}, {transform_indices = @transform_1, window_bounds = array<i64: 2, 1024>}, {transform_indices = @transform_2, window_bounds = array<i64: 2, 1024>}]} {
    %c0 = arith.constant 0 : index
    %c0_0 = arith.constant 0 : index
    %0 = vector.load %arg2[%c0, %c0_0] : memref<2x1024xi32, #tpu.memory_space<vmem>>, vector<2x1024xi32>
    %c0_i32 = arith.constant 0 : i32
    %c9_i32 = arith.constant 9 : i32
    %1 = vector.broadcast %c0_i32 : i32 to vector<2x1024xi32>
    %2 = arith.maxsi %1, %0 : vector<2x1024xi32>
    %3 = vector.broadcast %c9_i32 : i32 to vector<2x1024xi32>
    %4 = arith.minsi %3, %2 : vector<2x1024xi32>
    %c0_1 = arith.constant 0 : index
    %5 = memref.load %arg1[%c0_1] : memref<1xi32, #tpu.memory_space<smem>>
    %6 = vector.broadcast %5 : i32 to vector<2x1024xi32>
    %7 = arith.shrsi %6, %4 : vector<2x1024xi32>
    %c1_i32 = arith.constant 1 : i32
    %8 = vector.broadcast %c1_i32 : i32 to vector<2x1024xi32>
    %9 = arith.andi %7, %8 : vector<2x1024xi32>
    %c0_2 = arith.constant 0 : index
    %c0_3 = arith.constant 0 : index
    %10 = vector.load %arg3[%c0_2, %c0_3] : memref<2x1024xi32, #tpu.memory_space<vmem>>, vector<2x1024xi32>
    tpu.vector_store %arg3[%c0_2, %c0_3], %9 {strides = array<i32>} : memref<2x1024xi32, #tpu.memory_space<vmem>>, vector<2x1024xi32>,
    return
  }
  func.func @transform_0(%arg0: i32) -> i32 {
    %c0_i32 = arith.constant 0 : i32
    %c0_i32_0 = arith.constant 0 : i32
    return %c0_i32 : i32
  }
  func.func @transform_1(%arg0: i32) -> (i32, i32) {
    %c0_i32 = arith.constant 0 : i32
    %c0_i32_0 = arith.constant 0 : i32
    return %arg0, %c0_i32 : i32, i32
  }
  func.func @transform_2(%arg0: i32) -> (i32, i32) {
    %c0_i32 = arith.constant 0 : i32
    %c0_i32_0 = arith.constant 0 : i32
    return %arg0, %c0_i32 : i32, i32
  }
}

</mosaic_0001>

<bundles_post_ra>
// kernel: tpu_custom_call.1
= control target key start
LH: loop header
LB: loop body
LE: loop exit
PB: predicated region body
PF: predicated region fallthrough
CT: control target
= control target key end

     0   :  { %8 = vsyncpa [#allocation4], 0  ;;  %s152_s0 = inlined_call_operand.<no memory space> [shape: s32[1], index: 0, kind: input, shape index: {}]   ;;  %s153_s1 = inlined_call_operand.hbm [shape: s32[2,1024], index: 1, kind: input, shape index: {}]   ;;  %s154_s2 = inlined_call_operand.hbm [shape: s32[2,1024], index: 2, kind: output, shape index: {}]  }
   0x1   :  { %9 = vsyncpa [#allocation5], 0  ;;  %s108_s9 = smov [#allocation3]   ;;  %s60_s13 = scalar_lea.hbm %s153_s1, 256 }
   0x2   :  { %s18_s10 = sshll.u32 %s108_s9, 4  ;;  %p61_p0 = scmp.ne.s32.totalorder %s153_s1, %s60_s13  ;;  %s19_s10 = int_to_ptr.vmem [resolvable:$true] %s18_s10 }
   0x3   :  { %p64_p1 = scmp.lt.u32.totalorder %s60_s13, %s153_s1 }
   0x5   :  { %p66_p2 = pnand %p64_p1, %p61_p0 }
   0x7   :  { %69 = shalt.err (!%p66_p2)
}
   0x8   :  { %s70_s18 = scalar_lea.vmem %s19_s10, 256  ;;  %p75_p4 = scmp.lt.s32.totalorder %s19_s10, %s19_s10 }
   0x9   :  { %p71_p3 = scmp.ne.s32.totalorder %s19_s10, %s70_s18  ;;  %p76_p5 = scmp.lt.s32.totalorder %s70_s18, %s70_s18 }
   0xb   :  { %p77_p6 = por %p76_p5, %p75_p4 }
   0xd   :  { %p78_p7 = pnand %p77_p6, %p71_p3 }
   0xf   :  { %81 = shalt.err (!%p78_p7)
}
  0x10   :  { %21 = dma.hbm_to_vmem [thread:$0]  %s153_s1, 256, %s19_s10, [#allocation4]  }
  0x11   :  { %104 = dma.done.wait [#allocation4], 256  }
  0x12   :  { %105 = vsyncadd [#allocation4], 4294967040  ;;  %v25_v0 = vld [vmem:[#allocation3] sm:$0xff]  ;;  %v26_v1 = vld [vmem:[#allocation3 + $0x8] sm:$0xff]  ;;  %v36_v3 = vstv %s152_s0  ;;  %s109_s23 = smov [#allocation6]  }
  0x13   :  { %vm27_vm0 = vcmp.gt.s32.totalorder %v25_v0, 0  ;;  %vm29_vm1 = vcmp.gt.s32.totalorder %v26_v1, 0  ;;  %s49_s24 = sshll.u32 %s109_s23, 4  ;;  %s50_s24 = int_to_ptr.vmem [resolvable:$true] %s49_s24 }
  0x14   :  { %v28_v2 = vsel %vm27_vm0, %v25_v0, 0  ;;  %v30_v4 = vsel %vm29_vm1, %v26_v1, 0  ;;  %s82_s1 = scalar_lea.vmem %s50_s24, 256  ;;  %p87_p9 = scmp.lt.s32.totalorder %s50_s24, %s50_s24 }
  0x15   :  { %vm31_vm2 = vcmp.lt.s32.totalorder %v28_v2, 9  ;;  %vm33_vm3 = vcmp.lt.s32.totalorder %v30_v4, 9  ;;  %p83_p8 = scmp.ne.s32.totalorder %s50_s24, %s82_s1  ;;  %p88_p10 = scmp.lt.s32.totalorder %s82_s1, %s82_s1 }
  0x16   :  { %v32_v5 = vsel %vm31_vm2, %v28_v2, 9  ;;  %v34_v6 = vsel %vm33_vm3, %v30_v4, 9 }
  0x17   :  { %v37_v7 = vshra.s32 %v36_v3, %v32_v5  ;;  %v38_v8 = vshra.s32 %v36_v3, %v34_v6  ;;  %p89_p11 = por %p88_p10, %p87_p9 }
  0x19   :  { %v39_v9 = vand.u32 1, %v37_v7  ;;  %v40_v10 = vand.u32 1, %v38_v8  ;;  %p90_p12 = pnand %p89_p11, %p83_p8 }
  0x1b   :  { %41 = vst [vmem:[#allocation6] sm:$0xff] %v39_v9  ;;  %42 = vst [vmem:[#allocation6 + $0x8] sm:$0xff] %v40_v10 }
  0x1c   :  { %93 = shalt.err (!%p90_p12)
}
  0x1d   :  { %s94_s26 = scalar_lea.hbm %s154_s2, 256 }
  0x1e   :  { %p95_p13 = scmp.ne.s32.totalorder %s154_s2, %s94_s26  ;;  %p98_p0 = scmp.lt.u32.totalorder %s94_s26, %s154_s2 }
  0x20   :  { %p100_p1 = pnand %p98_p0, %p95_p13 }
  0x22   :  { %103 = shalt.err (!%p100_p1)
}
  0x23   :  { %52 = dma.vmem_to_hbm [thread:$0]  %s50_s24, 256, %s154_s2, [#allocation5]  }
  0x24   :  { %106 = dma.done.wait [#allocation5], 256  }
  0x25   :  { %107 = vsyncadd [#allocation5], 4294967040 }
  0x26   :  { %56 = vsyncpa [#allocation4], 1 }
  0x27   :  { %57 = vsyncpa [#allocation5], 1 }

</bundles_post_ra>
